<compile_context>
chip_gen: v7x
topology: tpu7x:2x2x1
jax: 0.10.0
libtpu: 0.0.40
codegen_flags: <defaults>
</compile_context>

<pallas_src>
import jax
import jax.numpy as jnp
from jax import lax
from jax.experimental import pallas as pl
from jax.experimental.pallas import tpu as pltpu

_LN_EPS = 1e-5  # nn.LayerNorm default eps


def _cls_decoder_kernel(x_ref, w1_ref, w2_ref, wo_ref, b12_ref, bo_ref, out_ref):
    # x_ref:   (TB, D)  f32 activations for this batch tile
    # w1/w2:   (D, D)   bf16, wo: (D, C) bf16   (LN affine already folded in)
    # b12_ref: (2, D)   f32  -- row 0 = bias of Linear1, row 1 = folded bias of Linear2
    # bo_ref:  (1, C)   f32  -- folded bias of the output Linear
    # out_ref: (TB, C)  f32
    h = x_ref[...]

    def linear_relu_ln(h, w_ref, bias):
        # Linear (+bias): bf16 operands on the MXU, f32 accumulation; ReLU on the VPU.
        y = jnp.dot(h.astype(jnp.bfloat16), w_ref[...],
                    preferred_element_type=jnp.float32) + bias
        y = jnp.maximum(y, 0.0)
        # Two-pass LayerNorm statistics (no E[y^2]-mean^2 cancellation);
        # gamma/beta were folded into the next Linear, so only normalize here.
        d = y.shape[-1]
        mean = jnp.sum(y, axis=-1, keepdims=True) * (1.0 / d)
        c = y - mean
        var = jnp.sum(c * c, axis=-1, keepdims=True) * (1.0 / d)
        return c * lax.rsqrt(var + _LN_EPS)

    h = linear_relu_ln(h, w1_ref, b12_ref[0:1, :])
    h = linear_relu_ln(h, w2_ref, b12_ref[1:2, :])

    out = jnp.dot(h.astype(jnp.bfloat16), wo_ref[...],
                  preferred_element_type=jnp.float32) + bo_ref[...]
    out_ref[...] = out.astype(out_ref.dtype)


def cls_decoder(x, params, *, block_b=4096):
    """x: [B, d_model] float32 -> logits [B, n_cls] float32.

    params: dict with
      w1, w2: (d_model, d_model)  (== torch Linear.weight.T)
      wo:     (d_model, n_cls)
      b1, b2: (1, d_model), bo: (1, n_cls)
      g1, g2, bt1, bt2: (1, d_model)  LayerNorm gamma / beta
    """
    B, D = x.shape
    C = params["wo"].shape[1]

    # ---- Fold LayerNorm affine into the following Linear (algebraic identity:
    #      (LN(y)*g + bt) @ W + b  ==  LN(y) @ (diag(g) W) + (bt @ W + b)). ----
    g1, bt1 = params["g1"].reshape(1, D), params["bt1"].reshape(1, D)
    g2, bt2 = params["g2"].reshape(1, D), params["bt2"].reshape(1, D)
    w1 = params["w1"]
    w2 = params["w2"] * g1.reshape(D, 1)
    b2 = params["b2"].reshape(1, D) + bt1 @ params["w2"]
    wo = params["wo"] * g2.reshape(D, 1)
    bo = params["bo"].reshape(1, C) + bt2 @ params["wo"]
    b12 = jnp.concatenate([params["b1"].reshape(1, D), b2], axis=0)   # packed (2, D)

    # bf16 MXU operands (weights are tiny and stay VMEM-resident); f32 accumulation.
    w1, w2, wo = (w.astype(jnp.bfloat16) for w in (w1, w2, wo))

    # ---- Batch tile: multiple of 8, large enough to amortise grid-step overhead,
    #      capped so the grid keeps >= ~4 steps (v7x megacore + pipelining).
    #      At tb=4096: 2 x (4096*128*4B) = 4 MiB of double-buffered x, well inside
    #      even v7x's scoped-VMEM default, so no vmem_limit_bytes override needed. ----
    if B <= 8:
        tb = B                                            # single full-dim block
    else:
        tb = max(8, (block_b // 8) * 8)                   # sublane-aligned user tile
        cap = ((max(8, -(-B // 4)) + 7) // 8) * 8         # ~ceil(B/4), 8-aligned
        tb = min(tb, cap)
    grid = (pl.cdiv(B, tb),)

    const = lambda shape: pl.BlockSpec(shape, lambda i: (0, 0))   # resident in VMEM

    return pl.pallas_call(
        _cls_decoder_kernel,
        out_shape=jax.ShapeDtypeStruct((B, C), jnp.float32),
        grid=grid,
        in_specs=[
            pl.BlockSpec((tb, D), lambda i: (i, 0)),      # x (streamed per tile)
            const((D, D)),                                # w1
            const((D, D)),                                # w2 (LN1 affine folded)
            const((D, C)),                                # wo (LN2 affine folded)
            const((2, D)),                                # packed biases [b1; b2']
            const((1, C)),                                # bo'
        ],
        out_specs=pl.BlockSpec((tb, C), lambda i: (i, 0)),
        compiler_params=pltpu.CompilerParams(
            dimension_semantics=("parallel",),            # megacore-shardable on v7x
        ),
    )(x, w1, w2, wo, b12, bo)


if __name__ == "__main__":
    key = jax.random.PRNGKey(0)
    d_model = 128
    n_cls = 10
    B = 16

    keys = jax.random.split(key, 11)

    def linear_init(kw, kb, fan_in, fan_out):
        # Matches torch nn.Linear default (uniform +-1/sqrt(fan_in)); weight stored
        # pre-transposed in (in, out) layout so the kernel computes x @ W.
        bound = 1.0 / (fan_in ** 0.5)
        w = jax.random.uniform(kw, (fan_in, fan_out), jnp.float32, -bound, bound)
        b = jax.random.uniform(kb, (1, fan_out), jnp.float32, -bound, bound)
        return w, b

    w1, b1 = linear_init(keys[0], keys[1], d_model, d_model)
    w2, b2 = linear_init(keys[2], keys[3], d_model, d_model)
    wo, bo = linear_init(keys[4], keys[5], d_model, n_cls)
    # Non-trivial LayerNorm affine params (exercises the fold-into-next-Linear path).
    g1 = 1.0 + 0.05 * jax.random.normal(keys[6], (1, d_model), jnp.float32)
    bt1 = 0.05 * jax.random.normal(keys[7], (1, d_model), jnp.float32)
    g2 = 1.0 + 0.05 * jax.random.normal(keys[8], (1, d_model), jnp.float32)
    bt2 = 0.05 * jax.random.normal(keys[9], (1, d_model), jnp.float32)

    x = jax.random.normal(keys[10], (B, d_model), jnp.float32)

    params = dict(w1=w1, b1=b1, g1=g1, bt1=bt1,
                  w2=w2, b2=b2, g2=g2, bt2=bt2,
                  wo=wo, bo=bo)

    # Small B -> tile caps to 8 rows, grid of 2 steps (exercises the parallel grid).
    out = cls_decoder(x, params)
    jax.block_until_ready(out)

    # Pure-JAX reference (f32 math; the kernel uses bf16 MXU operands with f32
    # accumulation, hence the relaxed tolerance).
    def ref_forward(x):
        h = x
        for (w, b, g, bt) in ((w1, b1, g1, bt1), (w2, b2, g2, bt2)):
            h = jnp.dot(h, w, preferred_element_type=jnp.float32) + b
            h = jnp.maximum(h, 0.0)
            mu = h.mean(-1, keepdims=True)
            var = ((h - mu) ** 2).mean(-1, keepdims=True)
            h = (h - mu) / jnp.sqrt(var + _LN_EPS) * g + bt
        return jnp.dot(h, wo, preferred_element_type=jnp.float32) + bo

    expected = ref_forward(x)
    assert out.shape == (B, n_cls)
    max_err = float(jnp.max(jnp.abs(out - expected)))
    assert jnp.allclose(out, expected, atol=2.5e-2, rtol=2.5e-2), max_err

    print("KERNEL_OK")
</pallas_src>

<mosaic_0001>
module attributes {stable_mosaic.version = 11 : i64} {
  func.func @_cls_decoder_kernel(%arg0: i32, %arg1: memref<8x128xf32, #tpu.memory_space<vmem>>, %arg2: memref<128x128xbf16, #tpu.memory_space<vmem>>, %arg3: memref<128x128xbf16, #tpu.memory_space<vmem>>, %arg4: memref<128x10xbf16, #tpu.memory_space<vmem>>, %arg5: memref<2x128xf32, #tpu.memory_space<vmem>>, %arg6: memref<1x10xf32, #tpu.memory_space<vmem>>, %arg7: memref<8x10xf32, #tpu.memory_space<vmem>>) attributes {dimension_semantics = [#tpu.dimension_semantics<parallel>], iteration_bounds = array<i64: 2>, scalar_prefetch = 0 : i64, scratch_operands = 0 : i64, tpu.core_type = #tpu.core_type<tc>, window_params = [{transform_indices = @transform_0, window_bounds = array<i64: 8, 128>}, {pipeline_mode = #tpu.pipeline_mode<synchronous>, transform_indices = @transform_1, window_bounds = array<i64: 128, 128>}, {pipeline_mode = #tpu.pipeline_mode<synchronous>, transform_indices = @transform_2, window_bounds = array<i64: 128, 128>}, {pipeline_mode = #tpu.pipeline_mode<synchronous>, transform_indices = @transform_3, window_bounds = array<i64: 128, 10>}, {pipeline_mode = #tpu.pipeline_mode<synchronous>, transform_indices = @transform_4, window_bounds = array<i64: 2, 128>}, {pipeline_mode = #tpu.pipeline_mode<synchronous>, transform_indices = @transform_5, window_bounds = array<i64: 1, 10>}, {transform_indices = @transform_6, window_bounds = array<i64: 8, 10>}]} {
    %c0 = arith.constant 0 : index
    %c0_0 = arith.constant 0 : index
    %0 = vector.load %arg1[%c0, %c0_0] : memref<8x128xf32, #tpu.memory_space<vmem>>, vector<8x128xf32>
    %c0_1 = arith.constant 0 : index
    %c0_2 = arith.constant 0 : index
    %1 = vector.load %arg5[%c0_1, %c0_2] : memref<2x128xf32, #tpu.memory_space<vmem>>, vector<1x128xf32>
    %2 = arith.truncf %0 : vector<8x128xf32> to vector<8x128xbf16>
    %c0_3 = arith.constant 0 : index
    %c0_4 = arith.constant 0 : index
    %3 = vector.load %arg2[%c0_3, %c0_4] : memref<128x128xbf16, #tpu.memory_space<vmem>>, vector<128x128xbf16>
    %cst = arith.constant dense<0.000000e+00> : vector<8x128xf32>
    %4 = tpu.matmul %2, %3, %cst {dimension_numbers = #tpu.dot_dimension_numbers<[1], [0], [0], [1], [0, 0, 1, 1], [], []>} : vector<8x128xbf16>, vector<128x128xbf16>, vector<8x128xf32> -> vector<8x128xf32>
    %5 = vector.broadcast %1 : vector<1x128xf32> to vector<8x128xf32>
    %6 = arith.addf %4, %5 : vector<8x128xf32>
    %cst_5 = arith.constant 0.000000e+00 : f32
    %7 = vector.broadcast %cst_5 : f32 to vector<8x128xf32>
    %8 = arith.maximumf %6, %7 : vector<8x128xf32>
    %cst_6 = arith.constant dense<0.000000e+00> : vector<8xf32>
    %9 = vector.multi_reduction <add>, %8, %cst_6 [1] : vector<8x128xf32> to vector<8xf32>
    %10 = vector.shape_cast %9 : vector<8xf32> to vector<8x1xf32>
    %cst_7 = arith.constant 7.812500e-03 : f32
    %11 = vector.broadcast %cst_7 : f32 to vector<8x1xf32>
    %12 = arith.mulf %10, %11 : vector<8x1xf32>
    %13 = vector.broadcast %12 : vector<8x1xf32> to vector<8x128xf32>
    %14 = arith.subf %8, %13 : vector<8x128xf32>
    %15 = arith.mulf %14, %14 : vector<8x128xf32>
    %cst_8 = arith.constant dense<0.000000e+00> : vector<8xf32>
    %16 = vector.multi_reduction <add>, %15, %cst_8 [1] : vector<8x128xf32> to vector<8xf32>
    %17 = vector.shape_cast %16 : vector<8xf32> to vector<8x1xf32>
    %cst_9 = arith.constant 7.812500e-03 : f32
    %18 = vector.broadcast %cst_9 : f32 to vector<8x1xf32>
    %19 = arith.mulf %17, %18 : vector<8x1xf32>
    %cst_10 = arith.constant 9.99999974E-6 : f32
    %20 = vector.broadcast %cst_10 : f32 to vector<8x1xf32>
    %21 = arith.addf %19, %20 : vector<8x1xf32>
    %22 = math.rsqrt %21 : vector<8x1xf32>
    %23 = vector.broadcast %22 : vector<8x1xf32> to vector<8x128xf32>
    %24 = arith.mulf %14, %23 : vector<8x128xf32>
    %c1 = arith.constant 1 : index
    %c0_11 = arith.constant 0 : index
    %25 = vector.load %arg5[%c1, %c0_11] : memref<2x128xf32, #tpu.memory_space<vmem>>, vector<1x128xf32>
    %26 = arith.truncf %24 : vector<8x128xf32> to vector<8x128xbf16>
    %c0_12 = arith.constant 0 : index
    %c0_13 = arith.constant 0 : index
    %27 = vector.load %arg3[%c0_12, %c0_13] : memref<128x128xbf16, #tpu.memory_space<vmem>>, vector<128x128xbf16>
    %cst_14 = arith.constant dense<0.000000e+00> : vector<8x128xf32>
    %28 = tpu.matmul %26, %27, %cst_14 {dimension_numbers = #tpu.dot_dimension_numbers<[1], [0], [0], [1], [0, 0, 1, 1], [], []>} : vector<8x128xbf16>, vector<128x128xbf16>, vector<8x128xf32> -> vector<8x128xf32>
    %29 = vector.broadcast %25 : vector<1x128xf32> to vector<8x128xf32>
    %30 = arith.addf %28, %29 : vector<8x128xf32>
    %cst_15 = arith.constant 0.000000e+00 : f32
    %31 = vector.broadcast %cst_15 : f32 to vector<8x128xf32>
    %32 = arith.maximumf %30, %31 : vector<8x128xf32>
    %cst_16 = arith.constant dense<0.000000e+00> : vector<8xf32>
    %33 = vector.multi_reduction <add>, %32, %cst_16 [1] : vector<8x128xf32> to vector<8xf32>
    %34 = vector.shape_cast %33 : vector<8xf32> to vector<8x1xf32>
    %cst_17 = arith.constant 7.812500e-03 : f32
    %35 = vector.broadcast %cst_17 : f32 to vector<8x1xf32>
    %36 = arith.mulf %34, %35 : vector<8x1xf32>
    %37 = vector.broadcast %36 : vector<8x1xf32> to vector<8x128xf32>
    %38 = arith.subf %32, %37 : vector<8x128xf32>
    %39 = arith.mulf %38, %38 : vector<8x128xf32>
    %cst_18 = arith.constant dense<0.000000e+00> : vector<8xf32>
    %40 = vector.multi_reduction <add>, %39, %cst_18 [1] : vector<8x128xf32> to vector<8xf32>
    %41 = vector.shape_cast %40 : vector<8xf32> to vector<8x1xf32>
    %cst_19 = arith.constant 7.812500e-03 : f32
    %42 = vector.broadcast %cst_19 : f32 to vector<8x1xf32>
    %43 = arith.mulf %41, %42 : vector<8x1xf32>
    %cst_20 = arith.constant 9.99999974E-6 : f32
    %44 = vector.broadcast %cst_20 : f32 to vector<8x1xf32>
    %45 = arith.addf %43, %44 : vector<8x1xf32>
    %46 = math.rsqrt %45 : vector<8x1xf32>
    %47 = vector.broadcast %46 : vector<8x1xf32> to vector<8x128xf32>
    %48 = arith.mulf %38, %47 : vector<8x128xf32>
    %49 = arith.truncf %48 : vector<8x128xf32> to vector<8x128xbf16>
    %c0_21 = arith.constant 0 : index
    %c0_22 = arith.constant 0 : index
    %50 = vector.load %arg4[%c0_21, %c0_22] : memref<128x10xbf16, #tpu.memory_space<vmem>>, vector<128x10xbf16>
    %cst_23 = arith.constant dense<0.000000e+00> : vector<8x10xf32>
    %51 = tpu.matmul %49, %50, %cst_23 {dimension_numbers = #tpu.dot_dimension_numbers<[1], [0], [0], [1], [0, 0, 1, 1], [], []>} : vector<8x128xbf16>, vector<128x10xbf16>, vector<8x10xf32> -> vector<8x10xf32>
    %c0_24 = arith.constant 0 : index
    %c0_25 = arith.constant 0 : index
    %52 = vector.load %arg6[%c0_24, %c0_25] : memref<1x10xf32, #tpu.memory_space<vmem>>, vector<1x10xf32>
    %53 = vector.broadcast %52 : vector<1x10xf32> to vector<8x10xf32>
    %54 = arith.addf %51, %53 : vector<8x10xf32>
    %c0_26 = arith.constant 0 : index
    %c0_27 = arith.constant 0 : index
    %55 = vector.load %arg7[%c0_26, %c0_27] : memref<8x10xf32, #tpu.memory_space<vmem>>, vector<8x10xf32>
    tpu.vector_store %arg7[%c0_26, %c0_27], %54 {strides = array<i32>} : memref<8x10xf32, #tpu.memory_space<vmem>>, vector<8x10xf32>,
    return
  }
  func.func @transform_0(%arg0: i32) -> (i32, i32) {
    %c0_i32 = arith.constant 0 : i32
    %c0_i32_0 = arith.constant 0 : i32
    return %arg0, %c0_i32 : i32, i32
  }
  func.func @transform_1(%arg0: i32) -> (i32, i32) {
    %c0_i32 = arith.constant 0 : i32
    %c0_i32_0 = arith.constant 0 : i32
    %c0_i32_1 = arith.constant 0 : i32
    return %c0_i32, %c0_i32_0 : i32, i32
  }
  func.func @transform_2(%arg0: i32) -> (i32, i32) {
    %c0_i32 = arith.constant 0 : i32
    %c0_i32_0 = arith.constant 0 : i32
    %c0_i32_1 = arith.constant 0 : i32
    return %c0_i32, %c0_i32_0 : i32, i32
  }
  func.func @transform_3(%arg0: i32) -> (i32, i32) {
    %c0_i32 = arith.constant 0 : i32
    %c0_i32_0 = arith.constant 0 : i32
    %c0_i32_1 = arith.constant 0 : i32
    return %c0_i32, %c0_i32_0 : i32, i32
  }
  func.func @transform_4(%arg0: i32) -> (i32, i32) {
    %c0_i32 = arith.constant 0 : i32
    %c0_i32_0 = arith.constant 0 : i32
    %c0_i32_1 = arith.constant 0 : i32
    return %c0_i32, %c0_i32_0 : i32, i32
  }
  func.func @transform_5(%arg0: i32) -> (i32, i32) {
    %c0_i32 = arith.constant 0 : i32
    %c0_i32_0 = arith.constant 0 : i32
    %c0_i32_1 = arith.constant 0 : i32
    return %c0_i32, %c0_i32_0 : i32, i32
  }
  func.func @transform_6(%arg0: i32) -> (i32, i32) {
    %c0_i32 = arith.constant 0 : i32
    %c0_i32_0 = arith.constant 0 : i32
    return %arg0, %c0_i32 : i32, i32
  }
}

</mosaic_0001>

<bundles_post_ra>
// kernel: tpu_custom_call.1
= control target key start
LH: loop header
LB: loop body
LE: loop exit
PB: predicated region body
PF: predicated region fallthrough
CT: control target
= control target key end

     0   :  { %11 = vsyncpa [#allocation3], 0  ;;  %s1415_s0 = inlined_call_operand.hbm [shape: f32[16,128], index: 0, kind: input, shape index: {}]   ;;  %s1416_s1 = inlined_call_operand.vmem [shape: bf16[128,128], index: 1, kind: input, shape index: {}]   ;;  %s1417_s2 = inlined_call_operand.hbm [shape: bf16[128,128], index: 2, kind: input, shape index: {}]   ;;  %s1418_s3 = inlined_call_operand.vmem [shape: bf16[128,10], index: 3, kind: input, shape index: {}]   ;;  %s1419_s4 = inlined_call_operand.vmem [shape: f32[2,128], index: 4, kind: input, shape index: {}]   ;;  %s1420_s5 = inlined_call_operand.vmem [shape: f32[1,10], index: 5, kind: input, shape index: {}]   ;;  %s1421_s6 = inlined_call_operand.hbm [shape: f32[16,10], index: 6, kind: output, shape index: {}]  }
   0x1   :  { %13 = vsyncpa [#allocation3 + $0x1], 0 }
   0x2   :  { %14 = vsyncpa [#allocation6], 0 }
   0x3   :  { %15 = vsyncpa [#allocation4], 0 }
   0x4   :  { %17 = vsyncpa [#allocation4 + $0x1], 0  ;;  %s1125_s21 = smov 0   ;;  %s1127_s22 = smov 0  }
   0x5   :  { %s1129_s23 = smov 0   ;;  %s1131_s24 = smov 0  }
   0x6 LB: > { %s1146_s25 = sadd.s32 4294967295, %s1081_s24   ;;  %s736_s26 = sadd.s32 4294967294, %s1081_s24   ;;  %s1081_s24 = sphi %s1131_s24, %s1441_s24   ;;  %s1077_s23 = sphi %s1129_s23, %s1440_s23   ;;  %s1073_s22 = sphi %s1127_s22, %s1439_s22   ;;  %s1069_s21 = sphi %s1125_s21, %s1438_s21  }
   0x7   : > { %p43_p0 = scmp.ne.s32.totalorder %s1073_s22, %s1069_s21  ;;  %p1422_p1 = scmp.eq.s32.totalorder %s1146_s25, 0 }
   0x8   : > { %p178_p3 = scmp.eq.s32.totalorder %s736_s26, 1  ;;  %p737_p5 = scmp.ge.s32.totalorder %s1081_s24, 1 }
   0x9   : > { %p1155_p4 = por %p1422_p1, %p43_p0  ;;  %p185_p7 = scmp.lt.s32.totalorder %s1081_s24, 3 }
   0xa   : > { %p1160_p6 = por %p178_p3, %p43_p0  ;;  %s1083_s30 = smov [#allocation5]  }
   0xb   : > { %s1425_s27 = scalar_select %p1155_p4, 1, 0 }
   0xc   : > { %s1426_s28 = scalar_select %p1160_p6, 1, 0 }
   0xd   : > { %p1165_p8 = pnand %p737_p5, %p185_p7  ;;  %s200_s7 = sshll.u32 %s1083_s30, 4  ;;  %s1169_s7 = int_to_ptr.vmem [resolvable:$true] %s200_s7 }
   0xe   : > { %s1181_s9 = sadd.s32 1, %s1081_s24   ;;  %s30_s10 = sadd.s32 1, %s1077_s23 }
   0xf   : > { %s1427_s29 = scalar_select %p1165_p8, 1, 0 }
  0x10   : > { %p872_p9 = pneg %p1165_p8  ;;  %s27_s11 = ssub.s32 %s1081_s24, %s1181_s9 }
  0x11   : > { %s953_s14 = scalar_lea.hbm %s1417_s2, 1024 }
  0x12   : > { %p1176_p11 = pnand %p872_p9, %p1422_p1  ;;  %p954_p12 = scmp.ne.s32.totalorder %s1417_s2, %s953_s14 }
  0x13   : > { %p960_p5 = scmp.lt.u32.totalorder %s953_s14, %s1417_s2 }
  0x14   : > { %p955_p13 = pneg %p1176_p11 }
  0x16   : > { %p956_p0 = pnand %p955_p13, %p954_p12 }
  0x18   : > { %p957_p3 = pneg %p956_p0 }
  0x1a   : > { %p962_p7 = pnand %p960_p5, %p957_p3 }
  0x1c   : > { %965 = shalt.err (!%p962_p7)
}
  0x1d   : > { %s966_s19 = scalar_lea.vmem %s1169_s7, 1024  ;;  %p974_p2 = scmp.lt.s32.totalorder %s1169_s7, %s1169_s7 }
  0x1e   : > { %p967_p9 = scmp.ne.s32.totalorder %s1169_s7, %s966_s19  ;;  %p975_p6 = scmp.lt.s32.totalorder %s966_s19, %s966_s19 }
  0x20   : > { %p969_p10 = pnand %p967_p9, %p955_p13  ;;  %p976_p4 = por %p975_p6, %p974_p2 }
  0x22   : > { %p970_p1 = pneg %p969_p10 }
  0x24   : > { %p977_p8 = pnand %p976_p4, %p970_p1 }
  0x26   : > { %980 = shalt.err (!%p977_p8)
}
  0x27   : > { %s1084_s20 = smov 64   ;;  %s1085_s26 = smov 4  }
  0x28   : > { %875 = dma.hbm_to_vmem [thread:$0]  (!%p1176_p11), %s1417_s2, 1024, %s1169_s7, [#allocation6], %s1084_s20, %s1084_s20, %s1085_s26  }
  0x29   : > { %p28_p2 = scmp.eq.s32.totalorder %s27_s11, 0  ;;  %p37_p1 = scmp.ne.s32.totalorder %s1077_s23, %s1073_s22 }
  0x2a   : > { %p38_p4 = scmp.eq.s32.totalorder %s1081_s24, 0  ;;  %p885_p6 = scmp.lt.s32.totalorder %s1081_s24, 2 }
  0x2b   : > { %s1212_s13 = scalar_select %p28_p2, %s1077_s23, %s30_s10  }
  0x2c   : > { %p39_p8 = por %p38_p4, %p37_p1  ;;  %p1429_p10 = scmp.eq.s32.totalorder %s1146_s25, 1 }
  0x2d   : > { %s223_s15 = sand.u32 1, %s1077_s23   ;;  %s741_s16 = sshll.u32 %s1081_s24, 7 }
  0x2e   : > { %p1216_p12 = por %p1429_p10, %p37_p1  ;;  %s740_s17 = sshll.u32 %s223_s15, 3 }
  0x2f   : > { %s1225_s19 = scalar_lea.hbm %s1415_s0, %s741_s16  ;;  %s227_s7 = scalar_lea.vmem [#allocation2], %s740_s17 }
  0x30   : > { %s234_s10 = sshll.u32 %s227_s7, 4  ;;  %p1227_p11 = pnand %p885_p6, %p39_p8  ;;  %s1231_s10 = int_to_ptr.vmem [resolvable:$true] %s234_s10 }
  0x31   : > { %s224_s20 = scalar_lea.sflag [#allocation3], %s223_s15  ;;  %s981_s26 = scalar_lea.hbm %s1225_s19, 128 }
  0x32   : > { %p982_p13 = scmp.ne.s32.totalorder %s1225_s19, %s981_s26  ;;  %p983_p0 = pneg %p1227_p11 }
  0x33   : > { %s986_s16 = scalar_lea.hbm %s1415_s0, 256  ;;  %p987_p7 = scmp.lt.u32.totalorder %s1225_s19, %s1415_s0 }
  0x34   : > { %p984_p3 = pnand %p983_p0, %p982_p13  ;;  %p988_p9 = scmp.lt.u32.totalorder %s986_s16, %s981_s26 }
  0x35   : > { %p990_p1 = scmp.lt.u32.totalorder %s981_s26, %s1225_s19 }
  0x36   : > { %p985_p5 = pneg %p984_p3  ;;  %p989_p2 = por %p988_p9, %p987_p7 }
  0x38   : > { %p991_p4 = por %p990_p1, %p989_p2 }
  0x3a   : > { %p992_p6 = pnand %p991_p4, %p985_p5 }
  0x3c   : > { %995 = shalt.err (!%p992_p6)
}
  0x3d   : > { %s996_s15 = scalar_lea.vmem %s1231_s10, 128  ;;  %s1086_s18 = smov [#allocation2]  }
  0x3e   : > { %p997_p8 = scmp.ne.s32.totalorder %s1231_s10, %s996_s15  ;;  %s1001_s7 = sshll.u32 %s1086_s18, 4  ;;  %s1002_s7 = int_to_ptr.vmem [resolvable:$false] %s1001_s7 }
  0x3f   : > { %s1003_s30 = scalar_lea.vmem %s1002_s7, 256  ;;  %p1004_p3 = scmp.lt.s32.totalorder %s1231_s10, %s1002_s7 }
  0x40   : > { %p999_p10 = pnand %p997_p8, %p983_p0  ;;  %p1005_p7 = scmp.lt.s32.totalorder %s1003_s30, %s996_s15 }
  0x42   : > { %p1000_p13 = pneg %p999_p10  ;;  %p1006_p9 = por %p1005_p7, %p1004_p3 }
  0x44   : > { %p1007_p2 = pnand %p1006_p9, %p1000_p13 }
  0x46   : > { %1010 = shalt.err (!%p1007_p2)
}
  0x47   : > { %879 = dma.hbm_to_vmem [thread:$0]  (!%p1227_p11), %s1225_s19, 128, %s1231_s10, %s224_s20  }
  0x48   : > { %p1432_p5 = scmp.ne.s32.totalorder %s1427_s29, 0 }
  0x49   : > { %s1261_s26 = sand.u32 (!%p1432_p5), 1, %s1073_s22   ;;  %p1433_p0 = scmp.ne.s32.totalorder (!%p1432_p5), %s1425_s27, 0 }
  0x4a   : > { %243 = sbr.rel (%p1432_p5) target bundleno = 1397 (0x575), region = 44  ;;  %s743_s12 = sshll.u32 (!%p1432_p5), %s1261_s26, 3 }
  0x4b   : > { %s246_s16 = scalar_lea.sflag (!%p1432_p5), [#allocation3], %s1261_s26  ;;  %s1267_s17 = scalar_lea.vmem (!%p1432_p5), [#allocation2], %s743_s12 }
  0x51   : > { %1056 = dma.done.wait (%p1433_p0), %s246_s16, 128  }
  0x52   : > { %1058 = vsyncadd (%p1433_p0), %s246_s16, 4294967168  ;;  %p1434_p11 = scmp.eq.s32.totalorder %s1146_s25, 0 }
  0x54   : > { %1060 = dma.done.wait (%p1434_p11), [#allocation6], 1024   ;;  %p1435_p1 = pmov %p1434_p11 }
  0x55   : > { %v1087_v0 = vmov 0.0   ;;  %vm1088_vm0 = vmmov 0   ;;  %v925_v1 = vld [vmem:[%s1416_s1] sm:$0xff]   ;;  %v926_v2 = vld [vmem:[%s1416_s1 + $0x8] sm:$0xff]   ;;  %v927_v3 = vld [vmem:[%s1416_s1 + $0x10] sm:$0xff]   ;;  %s774_s27 = sshll.u32 %s1146_s25, 7 }
  0x56   : > { %1062 = vsyncadd (%p1435_p1), [#allocation6], 4294966272  ;;  %804 = vmatprep.subr.bf16.mxu0 %v1087_v0  ;;  %820 = vmatprep.mubr.msk.bf16.mxu0 %vm1088_vm0, %v1087_v0  ;;  %v928_v4 = vld [vmem:[%s1416_s1 + $0x18] sm:$0xff]   ;;  %v929_v5 = vld [vmem:[%s1416_s1 + $0x20] sm:$0xff]   ;;  %s281_s29 = scalar_lea.vmem [#allocation7], %s743_s12  ;;  %vm640_vm1 = vcmask 80896   ;;  %s1371_s20 = scalar_lea.hbm %s1421_s6, %s774_s27 }
  0x57   : > { %824 = vmatprep.subr.bf16.mxu1 %v1087_v0  ;;  %840 = vmatprep.mubr.msk.bf16.mxu1 %vm1088_vm0, %v1087_v0  ;;  %v930_v6 = vld [vmem:[%s1416_s1 + $0x28] sm:$0xff]   ;;  %v931_v7 = vld [vmem:[%s1416_s1 + $0x30] sm:$0xff]   ;;  %v932_v8 = vld [vmem:[%s1416_s1 + $0x38] sm:$0xff]   ;;  %s656_s19 = sshll.u32 %s281_s29, 4  ;;  %s643_s25 = scalar_lea.sflag [#allocation4], %s1261_s26  ;;  %s1373_s19 = int_to_ptr.vmem [resolvable:$true] %s656_s19 }
  0x58   : > { %805 = vmatpush3.bf16.msra.mxu0 %v925_v1  ;;  %v283_v9 = vld [vmem:[%s1267_s17] sm:$0xff]  ;;  %v933_v18 = vld [vmem:[#allocation5] sm:$0xff]   ;;  %v934_v19 = vld [vmem:[#allocation5 + $0x8] sm:$0xff]   ;;  %s1011_s12 = scalar_lea.vmem %s1373_s19, 128  ;;  %s1089_s17 = smov [#allocation7]  }
  0x59   : > { %806 = vmatprep.subr.bf16.mxu0 %v1087_v0  ;;  %v285_v10 = vpack.c.bf16 %v283_v9, %v283_v9  ;;  %v746_v11 = vld [vmem:[%s1419_s4] ss:$0 sm:$0xff]  ;;  %825 = vmatpush3.bf16.msra.mxu1 %v933_v18  ;;  %v936_v25 = vld [vmem:[#allocation5 + $0x18] sm:$0xff]   ;;  %v937_v26 = vld [vmem:[#allocation5 + $0x20] sm:$0xff]   ;;  %p1012_p4 = scmp.ne.s32.totalorder %s1373_s19, %s1011_s12  ;;  %s1015_s8 = sshll.u32 %s1089_s17, 4  ;;  %s1016_s8 = int_to_ptr.vmem [resolvable:$false] %s1015_s8 }
  0x5a   : > { %826 = vmatprep.subr.bf16.mxu1 %v1087_v0  ;;  %v935_v20 = vld [vmem:[#allocation5 + $0x10] sm:$0xff]   ;;  %v938_v27 = vld [vmem:[#allocation5 + $0x28] sm:$0xff]   ;;  %v940_v29 = vld [vmem:[#allocation5 + $0x38] sm:$0xff]   ;;  %s1017_s15 = scalar_lea.vmem %s1016_s8, 256  ;;  %p1018_p10 = scmp.lt.s32.totalorder %s1373_s19, %s1016_s8 }
  0x5b   : > { %v939_v28 = vld [vmem:[#allocation5 + $0x30] sm:$0xff]   ;;  %v942_v44 = vld [vmem:[%s1418_s3 + $0x8] sm:$0xff]   ;;  %v943_v45 = vld [vmem:[%s1418_s3 + $0x10] sm:$0xff]   ;;  %p1013_p6 = pnand %p1012_p4, %p1216_p12  ;;  %p1019_p13 = scmp.lt.s32.totalorder %s1017_s15, %s1011_s12 }
  0x5c   : > { %807 = vmatpush3.bf16.msra.mxu0 %v926_v2  ;;  %v755_v36 = vld [vmem:[%s1419_s4 + $0x1] ss:$0 sm:$0xff]  ;;  %v944_v50 = vld [vmem:[%s1418_s3 + $0x18] sm:$0xff]   ;;  %v946_v52 = vld [vmem:[%s1418_s3 + $0x28] sm:$0xff]  }
  0x5d   : > { %808 = vmatprep.subr.bf16.mxu0 %v1087_v0  ;;  %827 = vmatpush3.bf16.msra.mxu1 %v934_v19  ;;  %v941_v43 = vld [vmem:[%s1418_s3] sm:$0xff]   ;;  %v947_v53 = vld [vmem:[%s1418_s3 + $0x30] sm:$0xff]   ;;  %v948_v54 = vld [vmem:[%s1418_s3 + $0x38] sm:$0xff]   ;;  %p1014_p8 = pneg %p1013_p6  ;;  %p1020_p3 = por %p1019_p13, %p1018_p10 }
  0x5e   : > { %828 = vmatprep.subr.bf16.mxu1 %v1087_v0  ;;  %v945_v51 = vld [vmem:[%s1418_s3 + $0x20] sm:$0xff]  }
  0x5f   : > { %v764_v61 = vld [vmem:[%s1420_s5] ss:$0 sm:$0xff]  ;;  %p1021_p7 = pnand %p1020_p3, %p1014_p8 }
  0x60   : > { %809 = vmatpush3.bf16.msra.mxu0 %v927_v3 }
  0x61   : > { %810 = vmatprep.subr.bf16.mxu0 %v1087_v0  ;;  %829 = vmatpush3.bf16.msra.mxu1 %v935_v20 }
  0x62   : > { %830 = vmatprep.subr.bf16.mxu1 %v1087_v0 }
  0x64   : > { %811 = vmatpush3.bf16.msra.mxu0 %v928_v4 }
  0x65   : > { %812 = vmatprep.subr.bf16.mxu0 %v1087_v0  ;;  %831 = vmatpush3.bf16.msra.mxu1 %v936_v25 }
  0x66   : > { %832 = vmatprep.subr.bf16.mxu1 %v1087_v0 }
  0x68   : > { %813 = vmatpush3.bf16.msra.mxu0 %v929_v5 }
  0x69   : > { %814 = vmatprep.subr.bf16.mxu0 %v1087_v0  ;;  %833 = vmatpush3.bf16.msra.mxu1 %v937_v26 }
  0x6a   : > { %834 = vmatprep.subr.bf16.mxu1 %v1087_v0 }
  0x6c   : > { %815 = vmatpush3.bf16.msra.mxu0 %v930_v6 }
  0x6d   : > { %816 = vmatprep.subr.bf16.mxu0 %v1087_v0  ;;  %835 = vmatpush3.bf16.msra.mxu1 %v938_v27 }
  0x6e   : > { %836 = vmatprep.subr.bf16.mxu1 %v1087_v0 }
  0x70   : > { %817 = vmatpush3.bf16.msra.mxu0 %v931_v7 }
  0x71   : > { %818 = vmatprep.subr.bf16.mxu0 %v1087_v0  ;;  %837 = vmatpush3.bf16.msra.mxu1 %v939_v28 }
  0x72   : > { %838 = vmatprep.subr.bf16.mxu1 %v1087_v0 }
  0x74   : > { %819 = vmatpush3.bf16.msra.mxu0 %v932_v8 }
  0x75   : > { %844 = vmatprep.subr.bf16.mxu0 %v1087_v0  ;;  %839 = vmatpush3.bf16.msra.mxu1 %v940_v29 }
  0x77   : > { %821 = vmatmul.mubr.bf16.vlgmr.msra.gmra.mrb[0].mxu0 %v285_v10 }
  0x78   : > { %860 = vmatprep.mubr.msk.bf16.mxu0 %vm1088_vm0, %v1087_v0  ;;  %845 = vmatpush3.bf16.msra.mxu0 %v941_v43 }
  0x79   : > { %846 = vmatprep.subr.bf16.mxu0 %v1087_v0 }
  0x7c   : > { %847 = vmatpush3.bf16.msra.mxu0 %v942_v44 }
  0x7d   : > { %848 = vmatprep.subr.bf16.mxu0 %v1087_v0 }
  0x80   : > { %849 = vmatpush3.bf16.msra.mxu0 %v943_v45 }
  0x81   : > { %850 = vmatprep.subr.bf16.mxu0 %v1087_v0 }
  0x84   : > { %851 = vmatpush3.bf16.msra.mxu0 %v944_v50 }
  0x85   : > { %852 = vmatprep.subr.bf16.mxu0 %v1087_v0 }
  0x88   : > { %853 = vmatpush3.bf16.msra.mxu0 %v945_v51 }
  0x89   : > { %854 = vmatprep.subr.bf16.mxu0 %v1087_v0 }
  0x8c   : > { %855 = vmatpush3.bf16.msra.mxu0 %v946_v52 }
  0x8d   : > { %856 = vmatprep.subr.bf16.mxu0 %v1087_v0 }
  0x90   : > { %857 = vmatpush3.bf16.msra.mxu0 %v947_v53 }
  0x91   : > { %858 = vmatprep.subr.bf16.mxu0 %v1087_v0 }
  0x94   : > { %859 = vmatpush3.bf16.msra.mxu0 %v948_v54 }
 0x14a   : > { %v388_v12 = vpop.f32.mrb[0].mxu0 }
 0x14b   : > { %v389_v13 = vadd.f32 %v746_v11, %v388_v12  ;;  %v822_v14 = vpop.f32.mrb[1].mxu0 }
 0x14c   : > { %v391_v15 = vpop.f32.mrb[2].mxu0 }
 0x14d   : > { %v394_v16 = vmax.f32 %v389_v13, 0.0  ;;  %v823_v17 = vpop.f32.mrb[3].mxu0 }
 0x14f   : > { %395 = vadd.xlane.f32.xlu0 %v394_v16 }
 0x1dc   : > { %v396_v21 = vpop.xlane.xlu0 %395 }
 0x1dd   : > { %v397_v22 = vmul.f32 0.0078125, %v396_v21 }
 0x1df   : > { %v398_v23 = vsub.f32 %v394_v16, %v397_v22 }
 0x1e1   : > { %v399_v24 = vmul.f32 %v398_v23, %v398_v23 }
 0x1e3   : > { %400 = vadd.xlane.f32.xlu0 %v399_v24 }
 0x270   : > { %v401_v30 = vpop.xlane.xlu0 %400 }
 0x271   : > { %v402_v31 = vmul.f32 0.0078125, %v401_v30 }
 0x273   : > { %v403_v32 = vadd.f32 1e-05, %v402_v31 }
 0x275   : > { %949 = vrsqrt.f32 %v403_v32 }
 0x27f   : > { %v950_v33 = vpop.eup %949 }
 0x280   : > { %v405_v34 = vmul.f32 %v950_v33, %v398_v23 }
 0x282   : > { %v407_v35 = vpack.c.bf16 %v405_v34, %v405_v34 }
 0x284   : > { %841 = vmatmul.mubr.bf16.vlgmr.msra.gmra.mrb[0].mxu1 %v407_v35 }
 0x357   : > { %v510_v37 = vpop.f32.mrb[0].mxu1 }
 0x358   : > { %v511_v38 = vadd.f32 %v755_v36, %v510_v37  ;;  %v842_v39 = vpop.f32.mrb[1].mxu1 }
 0x359   : > { %v513_v40 = vpop.f32.mrb[2].mxu1 }
 0x35a   : > { %v516_v41 = vmax.f32 %v511_v38, 0.0  ;;  %v843_v42 = vpop.f32.mrb[3].mxu1 }
 0x35c   : > { %517 = vadd.xlane.f32.xlu1 %v516_v41 }
 0x3e9   : > { %v518_v46 = vpop.xlane.xlu1 %517 }
 0x3ea   : > { %v519_v47 = vmul.f32 0.0078125, %v518_v46 }
 0x3ec   : > { %v520_v48 = vsub.f32 %v516_v41, %v519_v47 }
 0x3ee   : > { %v521_v49 = vmul.f32 %v520_v48, %v520_v48 }
 0x3f0   : > { %522 = vadd.xlane.f32.xlu1 %v521_v49 }
 0x47d   : > { %v523_v55 = vpop.xlane.xlu1 %522 }
 0x47e   : > { %v524_v56 = vmul.f32 0.0078125, %v523_v55 }
 0x480   : > { %v525_v57 = vadd.f32 1e-05, %v524_v56 }
 0x482   : > { %951 = vrsqrt.f32 %v525_v57 }
 0x48c   : > { %v952_v58 = vpop.eup %951 }
 0x48d   : > { %v527_v59 = vmul.f32 %v952_v58, %v520_v48 }
 0x48f   : > { %v528_v60 = vpack.c.bf16 %v527_v59, %v527_v59 }
 0x491   : > { %861 = vmatmul.mubr.bf16.vlgmr.msra.gmra.mrb[4].mxu0 %v528_v60 }
 0x564   : > { %v634_v62 = vpop.f32.mrb[4].mxu0 }
 0x565   : > { %v635_v63 = vadd.f32 %v764_v61, %v634_v62  ;;  %v862_v0 = vpop.f32.mrb[5].mxu0 }
 0x566   : > { %v637_v1 = vpop.f32.mrb[6].mxu0 }
 0x567   : > { %v863_v2 = vpop.f32.mrb[7].mxu0  ;;  %641 = vst.msk [vmem:[%s281_s29] sm:$0xff] %vm640_vm1, %v635_v63 }
 0x568   : > { %1024 = shalt.err (!%p1021_p7)
}
 0x569   : > { %s1025_s26 = scalar_lea.hbm %s1371_s20, 128  ;;  %s1029_s30 = scalar_lea.hbm %s1421_s6, 256 }
 0x56a   : > { %p1026_p9 = scmp.ne.s32.totalorder %s1371_s20, %s1025_s26  ;;  %p1030_p0 = scmp.lt.u32.totalorder %s1371_s20, %s1421_s6 }
 0x56b   : > { %p1031_p11 = scmp.lt.u32.totalorder %s1029_s30, %s1025_s26  ;;  %p1033_p4 = scmp.lt.u32.totalorder %s1025_s26, %s1371_s20 }
 0x56c   : > { %p1027_p2 = pnand %p1026_p9, %p1216_p12 }
 0x56d   : > { %p1032_p1 = por %p1031_p11, %p1030_p0 }
 0x56e   : > { %p1028_p5 = pneg %p1027_p2 }
 0x56f   : > { %p1034_p6 = por %p1033_p4, %p1032_p1 }
 0x571   : > { %p1035_p8 = pnand %p1034_p6, %p1028_p5 }
 0x573   : > { %1038 = shalt.err (!%p1035_p8)
}
 0x574   : > { %870 = dma.vmem_to_hbm [thread:$0]  (%p1216_p12), %s1373_s19, 128, %s1371_s20, %s643_s25  }
 0x575 PF: > { %s668_s29 = sand.u32 1, %s1069_s21   ;;  %p1436_p10 = scmp.ne.s32.totalorder %s1426_s28, 0 }
 0x576   : > { %p1437_p13 = scmp.ge.s32.totalorder %s1081_s24, 2  ;;  %s669_s10 = scalar_lea.sflag [#allocation4], %s668_s29 }
 0x578   : > { %p881_p3 = pnand %p1437_p13, %p1436_p10 }
 0x57a   : > { %1064 = dma.done.wait (!%p881_p3), %s669_s10, 128  }
 0x57b   : > { %1066 = vsyncadd (!%p881_p3), %s669_s10, 4294967168  ;;  %p20_p7 = scmp.ge.s32.totalorder %s1181_s9, 4   ;;  %s1438_s21 = smov %s1073_s22 }
 0x57c   : > { %s1439_s22 = smov %s1077_s23  ;;  %s1440_s23 = smov %s1212_s13 }
 0x57d   : > { %s1441_s24 = smov %s1181_s9  ;;  %22 = sbr.rel (!%p20_p7) target bundleno = 6 (0x6), region = 93 }
 0x584   :  { %674 = vsyncpa [#allocation3], 1 }
 0x585   :  { %676 = vsyncpa [#allocation3 + $0x1], 1 }
 0x586   :  { %677 = vsyncpa [#allocation6], 1 }
 0x587   :  { %678 = vsyncpa [#allocation4], 1 }
 0x588   :  { %680 = vsyncpa [#allocation4 + $0x1], 1 }

</bundles_post_ra>
